<compile_context>
chip_gen: v7x
topology: tpu7x:2x2x1
jax: 0.10.0
libtpu: 0.0.40
codegen_flags: <defaults>
</compile_context>

<pallas_src>
import functools

import jax
import jax.numpy as jnp
from jax import lax
from jax.experimental import pallas as pl
from jax.experimental.pallas import tpu as pltpu

HIDDEN = 64      # fixed by the module: nn.Linear(input_size, 64)
_LANE = 128
_SUBLANE = 8


def _round_up(v, m):
    return (v + m - 1) // m * m


def _gating_kernel(x_ref, w1_ref, b1_ref, w2_ref, b2_ref, o_ref, *, num_experts):
    # x:  (TB, FP)  bf16     w1: (FP, HP) bf16   b1: (1, HP) f32
    # w2: (HP, EP)  bf16     b2: (1, EP)  f32    o:  (TB, EP) f32
    # Linear 1 (bf16 MXU, f32 accumulate) + bias + ReLU in f32
    h = jnp.dot(x_ref[...], w1_ref[...], preferred_element_type=jnp.float32)
    h = jnp.maximum(h + b1_ref[...], 0.0)

    # Linear 2 (bf16 MXU, f32 accumulate) + bias
    logits = jnp.dot(h.astype(jnp.bfloat16), w2_ref[...],
                     preferred_element_type=jnp.float32) + b2_ref[...]

    # Padded expert lanes must not contribute to the softmax denominator.
    if logits.shape[1] != num_experts:
        lane = lax.broadcasted_iota(jnp.int32, logits.shape, 1)
        logits = jnp.where(lane < num_experts, logits, -1e30)

    # Numerically stable softmax over experts (dim=1), f32 throughout.
    m = jnp.max(logits, axis=1, keepdims=True)
    e = jnp.exp(logits - m)
    denom = jnp.sum(e, axis=1, keepdims=True)
    o_ref[...] = (e * pl.reciprocal(denom, approx=True)).astype(o_ref.dtype)


def gating_network(x, w1, b1, w2, b2, *, batch_tile=256):
    """x: (B, F) float32; w1: (F, 64), b1: (1, 64), w2: (64, E), b2: (1, E).
    Returns (B, E) float32 softmax gating weights."""
    B, F = x.shape
    H = w1.shape[1]
    E = w2.shape[1]

    # Lane-dense padded extents.
    FP = _round_up(F, _LANE)
    HP = _round_up(H, _LANE)
    EP = _round_up(E, _LANE)

    # Batch tile: multiple of the 8-row sublane, capped so 2x (double-buffer) bf16
    # x tiles stay small even for large F on the 64 MiB-VMEM v7x parts.
    TB = max(_SUBLANE, min(_round_up(B, _SUBLANE), batch_tile))
    BP = _round_up(B, TB)

    # Zero-pad to lane-dense shapes; matmul operands stored bf16 (halves HBM bytes),
    # biases kept f32 (added after the f32-accumulated dot).
    xp = jnp.pad(x, ((0, BP - B), (0, FP - F))).astype(jnp.bfloat16)
    w1p = jnp.pad(w1, ((0, FP - F), (0, HP - H))).astype(jnp.bfloat16)
    b1p = jnp.pad(b1, ((0, 0), (0, HP - H))).astype(jnp.float32)
    w2p = jnp.pad(w2, ((0, HP - H), (0, EP - E))).astype(jnp.bfloat16)
    b2p = jnp.pad(b2, ((0, 0), (0, EP - E))).astype(jnp.float32)

    kernel = functools.partial(_gating_kernel, num_experts=E)

    out_padded = pl.pallas_call(
        kernel,
        out_shape=jax.ShapeDtypeStruct((BP, EP), jnp.float32),
        grid=(BP // TB,),
        in_specs=[
            pl.BlockSpec((TB, FP), lambda i: (i, 0)),   # x: tiled over batch (pipelined)
            pl.BlockSpec((FP, HP), lambda i: (0, 0)),   # weights/biases: VMEM-resident,
            pl.BlockSpec((1, HP), lambda i: (0, 0)),    # same block every grid step
            pl.BlockSpec((HP, EP), lambda i: (0, 0)),
            pl.BlockSpec((1, EP), lambda i: (0, 0)),
        ],
        out_specs=pl.BlockSpec((TB, EP), lambda i: (i, 0)),
        compiler_params=pltpu.CompilerParams(
            dimension_semantics=("parallel",)),
    )(xp, w1p, b1p, w2p, b2p)

    return out_padded[:B, :E]


def init_params(key, input_size, num_experts):
    """Deterministic init matching nn.Linear shapes (stored transposed: (in, out))."""
    k1, k2, k3, k4 = jax.random.split(key, 4)
    lim1 = 1.0 / jnp.sqrt(input_size)
    lim2 = 1.0 / jnp.sqrt(HIDDEN)
    w1 = jax.random.uniform(k1, (input_size, HIDDEN), jnp.float32, -lim1, lim1)
    b1 = jax.random.uniform(k2, (1, HIDDEN), jnp.float32, -lim1, lim1)
    w2 = jax.random.uniform(k3, (HIDDEN, num_experts), jnp.float32, -lim2, lim2)
    b2 = jax.random.uniform(k4, (1, num_experts), jnp.float32, -lim2, lim2)
    return w1, b1, w2, b2


if __name__ == "__main__":
    batch = 2
    input_size = 32
    num_experts = 4

    key = jax.random.PRNGKey(0)
    kx, kp = jax.random.split(key)
    x = jax.random.normal(kx, (batch, input_size), jnp.float32)
    w1, b1, w2, b2 = init_params(kp, input_size, num_experts)

    out = jax.block_until_ready(gating_network(x, w1, b1, w2, b2))

    # Reference 1: bf16-matched (same matmul dtypes as the kernel) — tight tolerance.
    h_bf = jnp.dot(x.astype(jnp.bfloat16), w1.astype(jnp.bfloat16),
                   preferred_element_type=jnp.float32)
    h_bf = jnp.maximum(h_bf + b1, 0.0)
    logits_bf = jnp.dot(h_bf.astype(jnp.bfloat16), w2.astype(jnp.bfloat16),
                        preferred_element_type=jnp.float32) + b2
    ref_bf = jax.nn.softmax(logits_bf, axis=1)

    # Reference 2: pure f32 (original module semantics) — loose tolerance for bf16 MXU.
    ref_f32 = jax.nn.softmax(jnp.maximum(x @ w1 + b1, 0.0) @ w2 + b2, axis=1)

    assert out.shape == (batch, num_experts)
    assert jnp.allclose(out, ref_bf, atol=2e-3), "mismatch vs bf16-matched reference"
    assert jnp.allclose(out, ref_f32, atol=5e-2), "mismatch vs f32 reference"
    assert jnp.allclose(jnp.sum(out, axis=1), 1.0, atol=2e-3)

    print("KERNEL_OK")
</pallas_src>

<mosaic_0001>
module attributes {stable_mosaic.version = 11 : i64} {
  func.func @_gating_kernel(%arg0: i32, %arg1: memref<8x128xbf16, #tpu.memory_space<vmem>>, %arg2: memref<128x128xbf16, #tpu.memory_space<vmem>>, %arg3: memref<1x128xf32, #tpu.memory_space<vmem>>, %arg4: memref<128x128xbf16, #tpu.memory_space<vmem>>, %arg5: memref<1x128xf32, #tpu.memory_space<vmem>>, %arg6: memref<8x128xf32, #tpu.memory_space<vmem>>) attributes {dimension_semantics = [#tpu.dimension_semantics<parallel>], iteration_bounds = array<i64: 1>, scalar_prefetch = 0 : i64, scratch_operands = 0 : i64, tpu.core_type = #tpu.core_type<tc>, window_params = [{transform_indices = @transform_0, window_bounds = array<i64: 8, 128>}, {pipeline_mode = #tpu.pipeline_mode<synchronous>, transform_indices = @transform_1, window_bounds = array<i64: 128, 128>}, {pipeline_mode = #tpu.pipeline_mode<synchronous>, transform_indices = @transform_2, window_bounds = array<i64: 1, 128>}, {pipeline_mode = #tpu.pipeline_mode<synchronous>, transform_indices = @transform_3, window_bounds = array<i64: 128, 128>}, {pipeline_mode = #tpu.pipeline_mode<synchronous>, transform_indices = @transform_4, window_bounds = array<i64: 1, 128>}, {transform_indices = @transform_5, window_bounds = array<i64: 8, 128>}]} {
    %c0 = arith.constant 0 : index
    %c0_0 = arith.constant 0 : index
    %0 = vector.load %arg1[%c0, %c0_0] : memref<8x128xbf16, #tpu.memory_space<vmem>>, vector<8x128xbf16>
    %c0_1 = arith.constant 0 : index
    %c0_2 = arith.constant 0 : index
    %1 = vector.load %arg2[%c0_1, %c0_2] : memref<128x128xbf16, #tpu.memory_space<vmem>>, vector<128x128xbf16>
    %cst = arith.constant dense<0.000000e+00> : vector<8x128xf32>
    %2 = tpu.matmul %0, %1, %cst {dimension_numbers = #tpu.dot_dimension_numbers<[1], [0], [0], [1], [0, 0, 1, 1], [], []>} : vector<8x128xbf16>, vector<128x128xbf16>, vector<8x128xf32> -> vector<8x128xf32>
    %c0_3 = arith.constant 0 : index
    %c0_4 = arith.constant 0 : index
    %3 = vector.load %arg3[%c0_3, %c0_4] : memref<1x128xf32, #tpu.memory_space<vmem>>, vector<1x128xf32>
    %4 = vector.broadcast %3 : vector<1x128xf32> to vector<8x128xf32>
    %5 = arith.addf %2, %4 : vector<8x128xf32>
    %cst_5 = arith.constant 0.000000e+00 : f32
    %6 = vector.broadcast %cst_5 : f32 to vector<8x128xf32>
    %7 = arith.maximumf %5, %6 : vector<8x128xf32>
    %8 = arith.truncf %7 : vector<8x128xf32> to vector<8x128xbf16>
    %c0_6 = arith.constant 0 : index
    %c0_7 = arith.constant 0 : index
    %9 = vector.load %arg4[%c0_6, %c0_7] : memref<128x128xbf16, #tpu.memory_space<vmem>>, vector<128x128xbf16>
    %cst_8 = arith.constant dense<0.000000e+00> : vector<8x128xf32>
    %10 = tpu.matmul %8, %9, %cst_8 {dimension_numbers = #tpu.dot_dimension_numbers<[1], [0], [0], [1], [0, 0, 1, 1], [], []>} : vector<8x128xbf16>, vector<128x128xbf16>, vector<8x128xf32> -> vector<8x128xf32>
    %c0_9 = arith.constant 0 : index
    %c0_10 = arith.constant 0 : index
    %11 = vector.load %arg5[%c0_9, %c0_10] : memref<1x128xf32, #tpu.memory_space<vmem>>, vector<1x128xf32>
    %12 = vector.broadcast %11 : vector<1x128xf32> to vector<8x128xf32>
    %13 = arith.addf %10, %12 : vector<8x128xf32>
    %14 = tpu.iota {dimensions = array<i32: 1>} : vector<8x128xi32>
    %c4_i32 = arith.constant 4 : i32
    %15 = vector.broadcast %c4_i32 : i32 to vector<8x128xi32>
    %16 = arith.cmpi slt, %14, %15 : vector<8x128xi32>
    %cst_11 = arith.constant -1.000000e+30 : f32
    %17 = vector.broadcast %cst_11 : f32 to vector<8x128xf32>
    %18 = arith.select %16, %13, %17 : vector<8x128xi1>, vector<8x128xf32>
    %cst_12 = arith.constant dense<0xFF800000> : vector<8xf32>
    %19 = vector.multi_reduction <maximumf>, %18, %cst_12 [1] : vector<8x128xf32> to vector<8xf32>
    %20 = vector.shape_cast %19 : vector<8xf32> to vector<8x1xf32>
    %21 = vector.broadcast %20 : vector<8x1xf32> to vector<8x128xf32>
    %22 = arith.subf %18, %21 : vector<8x128xf32>
    %23 = math.exp %22 : vector<8x128xf32>
    %cst_13 = arith.constant dense<0.000000e+00> : vector<8xf32>
    %24 = vector.multi_reduction <add>, %23, %cst_13 [1] : vector<8x128xf32> to vector<8xf32>
    %25 = vector.shape_cast %24 : vector<8xf32> to vector<8x1xf32>
    %26 = tpu.reciprocal %25 {approx = true} : vector<8x1xf32> -> vector<8x1xf32>
    %27 = vector.broadcast %26 : vector<8x1xf32> to vector<8x128xf32>
    %28 = arith.mulf %23, %27 : vector<8x128xf32>
    %c0_14 = arith.constant 0 : index
    %c0_15 = arith.constant 0 : index
    %29 = vector.load %arg6[%c0_14, %c0_15] : memref<8x128xf32, #tpu.memory_space<vmem>>, vector<8x128xf32>
    tpu.vector_store %arg6[%c0_14, %c0_15], %28 {strides = array<i32>} : memref<8x128xf32, #tpu.memory_space<vmem>>, vector<8x128xf32>,
    return
  }
  func.func @transform_0(%arg0: i32) -> (i32, i32) {
    %c0_i32 = arith.constant 0 : i32
    %c0_i32_0 = arith.constant 0 : i32
    return %arg0, %c0_i32 : i32, i32
  }
  func.func @transform_1(%arg0: i32) -> (i32, i32) {
    %c0_i32 = arith.constant 0 : i32
    %c0_i32_0 = arith.constant 0 : i32
    %c0_i32_1 = arith.constant 0 : i32
    return %c0_i32, %c0_i32_0 : i32, i32
  }
  func.func @transform_2(%arg0: i32) -> (i32, i32) {
    %c0_i32 = arith.constant 0 : i32
    %c0_i32_0 = arith.constant 0 : i32
    %c0_i32_1 = arith.constant 0 : i32
    return %c0_i32, %c0_i32_0 : i32, i32
  }
  func.func @transform_3(%arg0: i32) -> (i32, i32) {
    %c0_i32 = arith.constant 0 : i32
    %c0_i32_0 = arith.constant 0 : i32
    %c0_i32_1 = arith.constant 0 : i32
    return %c0_i32, %c0_i32_0 : i32, i32
  }
  func.func @transform_4(%arg0: i32) -> (i32, i32) {
    %c0_i32 = arith.constant 0 : i32
    %c0_i32_0 = arith.constant 0 : i32
    %c0_i32_1 = arith.constant 0 : i32
    return %c0_i32, %c0_i32_0 : i32, i32
  }
  func.func @transform_5(%arg0: i32) -> (i32, i32) {
    %c0_i32 = arith.constant 0 : i32
    %c0_i32_0 = arith.constant 0 : i32
    return %arg0, %c0_i32 : i32, i32
  }
}

</mosaic_0001>

<bundles_post_ra>
// kernel: tpu_custom_call.1
= control target key start
LH: loop header
LB: loop body
LE: loop exit
PB: predicated region body
PF: predicated region fallthrough
CT: control target
= control target key end

     0   :  { %10 = vsyncpa [#allocation3], 0  ;;  %s612_s0 = inlined_call_operand.hbm [shape: bf16[8,128], index: 0, kind: input, shape index: {}]   ;;  %s613_s1 = inlined_call_operand.hbm [shape: bf16[128,128], index: 1, kind: input, shape index: {}]   ;;  %s614_s2 = inlined_call_operand.vmem [shape: f32[1,128], index: 2, kind: input, shape index: {}]   ;;  %s615_s3 = inlined_call_operand.hbm [shape: bf16[128,128], index: 3, kind: input, shape index: {}]   ;;  %s616_s4 = inlined_call_operand.vmem [shape: f32[1,128], index: 4, kind: input, shape index: {}]   ;;  %s617_s5 = inlined_call_operand.hbm [shape: f32[8,128], index: 5, kind: output, shape index: {}]  }
   0x1   :  { %11 = vsyncpa [#allocation6], 0 }
   0x2   :  { %12 = vsyncpa [#allocation4], 0  ;;  %s514_s18 = smov [#allocation5]   ;;  %s420_s22 = scalar_lea.hbm %s613_s1, 1024 }
   0x3   :  { %s28_s19 = sshll.u32 %s514_s18, 4  ;;  %p421_p0 = scmp.ne.s32.totalorder %s613_s1, %s420_s22  ;;  %s29_s19 = int_to_ptr.vmem [resolvable:$true] %s28_s19 }
   0x4   :  { %p424_p1 = scmp.lt.u32.totalorder %s420_s22, %s613_s1 }
   0x6   :  { %p426_p2 = pnand %p424_p1, %p421_p0 }
   0x8   :  { %429 = shalt.err (!%p426_p2)
}
   0x9   :  { %s430_s27 = scalar_lea.vmem %s29_s19, 1024  ;;  %p435_p4 = scmp.lt.s32.totalorder %s29_s19, %s29_s19 }
   0xa   :  { %p431_p3 = scmp.ne.s32.totalorder %s29_s19, %s430_s27  ;;  %p436_p5 = scmp.lt.s32.totalorder %s430_s27, %s430_s27 }
   0xc   :  { %p437_p6 = por %p436_p5, %p435_p4 }
   0xe   :  { %p438_p7 = pnand %p437_p6, %p431_p3 }
  0x10   :  { %441 = shalt.err (!%p438_p7)
}
  0x11   :  { %s515_s28 = smov 64   ;;  %s516_s29 = smov 4  }
  0x12   :  { %34 = dma.hbm_to_vmem [thread:$0]  %s613_s1, 1024, %s29_s19, [#allocation6], %s515_s28, %s515_s28, %s516_s29  }
  0x13   :  { %s517_s7 = smov [#allocation2]   ;;  %s518_s9 = smov [#allocation7]  }
  0x14   :  { %s19_s8 = sshll.u32 %s517_s7, 4  ;;  %s42_s10 = sshll.u32 %s518_s9, 4  ;;  %s20_s8 = int_to_ptr.vmem [resolvable:$true] %s19_s8  ;;  %s43_s10 = int_to_ptr.vmem [resolvable:$true] %s42_s10 }
  0x15   :  { %s442_s13 = scalar_lea.hbm %s612_s0, 64 }
  0x16   :  { %p443_p8 = scmp.ne.s32.totalorder %s612_s0, %s442_s13  ;;  %p446_p9 = scmp.lt.u32.totalorder %s442_s13, %s612_s0 }
  0x18   :  { %p448_p10 = pnand %p446_p9, %p443_p8 }
  0x1a   :  { %451 = shalt.err (!%p448_p10)
}
  0x1b   :  { %s452_s1 = scalar_lea.vmem %s20_s8, 64  ;;  %p457_p12 = scmp.lt.s32.totalorder %s20_s8, %s20_s8 }
  0x1c   :  { %p453_p11 = scmp.ne.s32.totalorder %s20_s8, %s452_s1  ;;  %p458_p13 = scmp.lt.s32.totalorder %s452_s1, %s452_s1 }
  0x1e   :  { %p459_p0 = por %p458_p13, %p457_p12 }
  0x20   :  { %p460_p1 = pnand %p459_p0, %p453_p11 }
  0x22   :  { %463 = shalt.err (!%p460_p1)
}
  0x23   :  { %22 = dma.hbm_to_vmem [thread:$0]  %s612_s0, 64, %s20_s8, [#allocation3]  }
  0x24   :  { %s464_s22 = scalar_lea.hbm %s615_s3, 1024 }
  0x25   :  { %p465_p2 = scmp.ne.s32.totalorder %s615_s3, %s464_s22  ;;  %p468_p3 = scmp.lt.u32.totalorder %s464_s22, %s615_s3 }
  0x27   :  { %p470_p4 = pnand %p468_p3, %p465_p2 }
  0x29   :  { %473 = shalt.err (!%p470_p4)
}
  0x2a   :  { %s474_s27 = scalar_lea.vmem %s43_s10, 1024  ;;  %p479_p6 = scmp.lt.s32.totalorder %s43_s10, %s43_s10 }
  0x2b   :  { %p475_p5 = scmp.ne.s32.totalorder %s43_s10, %s474_s27  ;;  %p480_p7 = scmp.lt.s32.totalorder %s474_s27, %s474_s27 }
  0x2d   :  { %p481_p8 = por %p480_p7, %p479_p6 }
  0x2f   :  { %p482_p9 = pnand %p481_p8, %p475_p5 }
  0x31   :  { %485 = shalt.err (!%p482_p9)
}
  0x32   :  { %48 = dma.hbm_to_vmem [thread:$0]  %s615_s3, 1024, %s43_s10, [#allocation6], %s515_s28, %s515_s28, %s516_s29  }
  0x33   :  { %508 = dma.done.wait [#allocation3], 64  }
  0x34   :  { %509 = vsyncadd [#allocation3], 4294967232 }
  0x35   :  { %510 = dma.done.wait [#allocation6], 2048  }
  0x36   :  { %511 = vsyncadd [#allocation6], 4294965248  ;;  %v519_v0 = vmov 0.0   ;;  %vm520_vm0 = vmmov 0   ;;  %v400_v1 = vld [vmem:[#allocation5] sm:$0xff]   ;;  %v401_v2 = vld [vmem:[#allocation5 + $0x8] sm:$0xff]   ;;  %v286_v26 = vlaneseq }
  0x37   :  { %352 = vmatprep.subr.bf16.mxu0 %v519_v0  ;;  %368 = vmatprep.mubr.msk.bf16.mxu0 %vm520_vm0, %v519_v0  ;;  %v402_v3 = vld [vmem:[#allocation5 + $0x10] sm:$0xff]   ;;  %v408_v4 = vld [vmem:[#allocation7] sm:$0xff]   ;;  %v403_v5 = vld [vmem:[#allocation5 + $0x18] sm:$0xff]  }
  0x38   :  { %372 = vmatprep.subr.bf16.mxu1 %v519_v0  ;;  %388 = vmatprep.mubr.msk.bf16.mxu1 %vm520_vm0, %v519_v0  ;;  %v409_v6 = vld [vmem:[#allocation7 + $0x8] sm:$0xff]   ;;  %v404_v7 = vld [vmem:[#allocation5 + $0x20] sm:$0xff]   ;;  %v410_v8 = vld [vmem:[#allocation7 + $0x10] sm:$0xff]   ;;  %v287_v27 = vand.u32 127, %v286_v26 }
  0x39   :  { %353 = vmatpush3.bf16.msra.mxu0 %v400_v1  ;;  %373 = vmatpush3.bf16.msra.mxu1 %v408_v4  ;;  %v405_v9 = vld [vmem:[#allocation5 + $0x28] sm:$0xff]   ;;  %v411_v10 = vld [vmem:[#allocation7 + $0x18] sm:$0xff]   ;;  %v406_v11 = vld [vmem:[#allocation5 + $0x30] sm:$0xff]  }
  0x3a   :  { %354 = vmatprep.subr.bf16.mxu0 %v519_v0  ;;  %374 = vmatprep.subr.bf16.mxu1 %v519_v0  ;;  %v412_v12 = vld [vmem:[#allocation7 + $0x20] sm:$0xff]   ;;  %v407_v13 = vld [vmem:[#allocation5 + $0x38] sm:$0xff]   ;;  %v413_v14 = vld [vmem:[#allocation7 + $0x28] sm:$0xff]   ;;  %vm288_vm1 = vcmp.lt.s32.totalorder %v287_v27, 4 }
  0x3b   :  { %v61_v15 = vld [vmem:[#allocation2] sm:$0xf]  ;;  %v414_v16 = vld [vmem:[#allocation7 + $0x30] sm:$0xff]  }
  0x3c   :  { %v415_v17 = vld [vmem:[#allocation7 + $0x38] sm:$0xff]  }
  0x3d   :  { %355 = vmatpush3.bf16.msra.mxu0 %v401_v2  ;;  %375 = vmatpush3.bf16.msra.mxu1 %v409_v6  ;;  %v316_v18 = vld [vmem:[%s614_s2] ss:$0 sm:$0xff]  ;;  %s521_s2 = smov [#allocation8]  }
  0x3e   :  { %356 = vmatprep.subr.bf16.mxu0 %v519_v0  ;;  %376 = vmatprep.subr.bf16.mxu1 %v519_v0  ;;  %v325_v28 = vld [vmem:[%s616_s4] ss:$0 sm:$0xff]  ;;  %s306_s7 = sshll.u32 %s521_s2, 4  ;;  %s307_s7 = int_to_ptr.vmem [resolvable:$true] %s306_s7 }
  0x3f   :  { %s486_s4 = scalar_lea.vmem %s307_s7, 128  ;;  %p491_p11 = scmp.lt.s32.totalorder %s307_s7, %s307_s7 }
  0x40   :  { %p487_p10 = scmp.ne.s32.totalorder %s307_s7, %s486_s4  ;;  %p492_p12 = scmp.lt.s32.totalorder %s486_s4, %s486_s4 }
  0x41   :  { %357 = vmatpush3.bf16.msra.mxu0 %v402_v3  ;;  %377 = vmatpush3.bf16.msra.mxu1 %v410_v8 }
  0x42   :  { %358 = vmatprep.subr.bf16.mxu0 %v519_v0  ;;  %378 = vmatprep.subr.bf16.mxu1 %v519_v0  ;;  %p493_p13 = por %p492_p12, %p491_p11 }
  0x44   :  { %p494_p0 = pnand %p493_p13, %p487_p10 }
  0x45   :  { %359 = vmatpush3.bf16.msra.mxu0 %v403_v5  ;;  %379 = vmatpush3.bf16.msra.mxu1 %v411_v10 }
  0x46   :  { %360 = vmatprep.subr.bf16.mxu0 %v519_v0  ;;  %380 = vmatprep.subr.bf16.mxu1 %v519_v0 }
  0x49   :  { %361 = vmatpush3.bf16.msra.mxu0 %v404_v7  ;;  %381 = vmatpush3.bf16.msra.mxu1 %v412_v12 }
  0x4a   :  { %362 = vmatprep.subr.bf16.mxu0 %v519_v0  ;;  %382 = vmatprep.subr.bf16.mxu1 %v519_v0 }
  0x4d   :  { %363 = vmatpush3.bf16.msra.mxu0 %v405_v9  ;;  %383 = vmatpush3.bf16.msra.mxu1 %v413_v14 }
  0x4e   :  { %364 = vmatprep.subr.bf16.mxu0 %v519_v0  ;;  %384 = vmatprep.subr.bf16.mxu1 %v519_v0 }
  0x51   :  { %365 = vmatpush3.bf16.msra.mxu0 %v406_v11  ;;  %385 = vmatpush3.bf16.msra.mxu1 %v414_v16 }
  0x52   :  { %366 = vmatprep.subr.bf16.mxu0 %v519_v0  ;;  %386 = vmatprep.subr.bf16.mxu1 %v519_v0 }
  0x55   :  { %367 = vmatpush3.bf16.msra.mxu0 %v407_v13  ;;  %387 = vmatpush3.bf16.msra.mxu1 %v415_v17 }
  0x58   :  { %369 = vmatmul.mubr.bf16.vlgmr.msra.gmra.mrb[0].mxu0 %v61_v15 }
 0x12b   :  { %v167_v19 = vpop.f32.mrb[0].mxu0 }
 0x12c   :  { %v168_v20 = vadd.f32 %v316_v18, %v167_v19  ;;  %v370_v21 = vpop.f32.mrb[1].mxu0 }
 0x12d   :  { %v170_v22 = vpop.f32.mrb[2].mxu0 }
 0x12e   :  { %v173_v23 = vmax.f32 %v168_v20, 0.0  ;;  %v371_v24 = vpop.f32.mrb[3].mxu0 }
 0x130   :  { %v174_v25 = vpack.c.bf16 %v173_v23, %v173_v23 }
 0x132   :  { %389 = vmatmul.mubr.bf16.vlgmr.msra.gmra.mrb[0].mxu1 %v174_v25 }
 0x205   :  { %v280_v29 = vpop.f32.mrb[0].mxu1 }
 0x206   :  { %v281_v30 = vadd.f32 %v325_v28, %v280_v29  ;;  %v390_v31 = vpop.f32.mrb[1].mxu1 }
 0x207   :  { %v283_v32 = vpop.f32.mrb[2].mxu1 }
 0x208   :  { %v391_v33 = vpop.f32.mrb[3].mxu1  ;;  %v289_v34 = vsel %vm288_vm1, %v281_v30, -1e+30 }
 0x209   :  { %290 = vmax.xlane.f32.xlu0 %v289_v34 }
 0x296   :  { %v291_v35 = vpop.xlane.xlu0 %290 }
 0x297   :  { %v292_v36 = vsub.f32 %v289_v34, %v291_v35 }
 0x299   :  { %v293_v37 = vmul.f32 1.442695, %v292_v36 }
 0x29b   :  { %416 = vpow2.f32 %v293_v37 }
 0x2a5   :  { %v417_v38 = vpop.eup %416 }
 0x2a6   :  { %295 = vadd.xlane.f32.xlu0 %v417_v38 }
 0x333   :  { %v296_v39 = vpop.xlane.xlu0 %295 }
 0x334   :  { %418 = vrcp.f32 %v296_v39 }
 0x33e   :  { %v419_v40 = vpop.eup %418 }
 0x33f   :  { %v298_v41 = vmul.f32 %v419_v40, %v417_v38 }
 0x341   :  { %299 = vst [vmem:[#allocation8] sm:$0xff] %v298_v41 }
 0x342   :  { %497 = shalt.err (!%p494_p0)
}
 0x343   :  { %s498_s10 = scalar_lea.hbm %s617_s5, 128 }
 0x344   :  { %p499_p1 = scmp.ne.s32.totalorder %s617_s5, %s498_s10  ;;  %p502_p2 = scmp.lt.u32.totalorder %s498_s10, %s617_s5 }
 0x346   :  { %p504_p3 = pnand %p502_p2, %p499_p1 }
 0x348   :  { %507 = shalt.err (!%p504_p3)
}
 0x349   :  { %309 = dma.vmem_to_hbm [thread:$0]  %s307_s7, 128, %s617_s5, [#allocation4]  }
 0x34a   :  { %512 = dma.done.wait [#allocation4], 128  }
 0x34b   :  { %513 = vsyncadd [#allocation4], 4294967168 }
 0x34c   :  { %313 = vsyncpa [#allocation3], 1 }
 0x34d   :  { %314 = vsyncpa [#allocation6], 1 }
 0x34e   :  { %315 = vsyncpa [#allocation4], 1 }

</bundles_post_ra>
